<compile_context>
chip_gen: v5e
topology: v5e:2x2
jax: 0.10.0
libtpu: 0.0.40
codegen_flags: <defaults>
</compile_context>

<pallas_src>
import math

import jax
import jax.numpy as jnp
from jax.experimental import pallas as pl
from jax.experimental.pallas import tpu as pltpu

_LANE = 128
_SUBLANE = 8


def _round_up(x, m):
    return (x + m - 1) // m * m


def _mlp_kernel(x_ref, w1_ref, b1_ref, w2_ref, b2_ref, w3_ref, b3_ref, o_ref):
    # All three Linear+ReLU layers fused: matmuls on the MXU (f32 accumulate),
    # bias broadcast + ReLU on the VPU (full-vreg, lane-dense after padding).
    x = x_ref[...].astype(w1_ref.dtype)
    h1 = jnp.dot(x, w1_ref[...], preferred_element_type=jnp.float32)
    h1 = jnp.maximum(h1 + b1_ref[...], 0.0)
    h2 = jnp.dot(h1.astype(w2_ref.dtype), w2_ref[...],
                 preferred_element_type=jnp.float32)
    h2 = jnp.maximum(h2 + b2_ref[...], 0.0)
    h3 = jnp.dot(h2.astype(w3_ref.dtype), w3_ref[...],
                 preferred_element_type=jnp.float32)
    h3 = jnp.maximum(h3 + b3_ref[...], 0.0)
    o_ref[...] = h3.astype(o_ref.dtype)


def channel_encoder_forward(secret, params, *, block_m=512, weight_dtype=None):
    """secret: [B, secret_size] float32.

    params: dict with w1,b1,w2,b2,w3,b3 (weights [in,out], biases [1,out]).
    weight_dtype: None keeps f32; jnp.bfloat16 enables bf16 MXU operands with
      f32 accumulation (recommended on v6e / v7x).
    """
    w1, b1 = params["w1"], params["b1"]
    w2, b2 = params["w2"], params["b2"]
    w3, b3 = params["w3"], params["b3"]

    B, d0 = secret.shape
    h1_dim, h2_dim, out_dim = w1.shape[1], w2.shape[1], w3.shape[1]

    # Lane-dense zero padding of feature dims (numerically exact under ReLU:
    # padded columns yield ReLU(0)=0 and multiply into zero-padded weight rows).
    # h2 (=192 for secret_size=32) only lives in vregs, so it stays unpadded.
    h1p = _round_up(h1_dim, _LANE)
    outp = _round_up(out_dim, _LANE)

    def pad_to(a, shape):
        pads = [(0, t - s) for s, t in zip(a.shape, shape)]
        return jnp.pad(a, pads) if any(p[1] for p in pads) else a

    w1p = pad_to(w1, (d0, h1p))
    b1p = pad_to(b1, (1, h1p))
    w2p = pad_to(w2, (h1p, h2_dim))
    b2p = b2
    w3p = pad_to(w3, (h2_dim, outp))
    b3p = pad_to(b3, (1, outp))

    if weight_dtype is not None:
        w1p, w2p, w3p = (w.astype(weight_dtype) for w in (w1p, w2p, w3p))

    # Batch tiling: large row tiles amortize the ~0.35us per-step overhead;
    # the ragged last tile is handled by zero-padding rows (sliced off below).
    bm = min(_round_up(block_m, _SUBLANE), _round_up(B, _SUBLANE))
    Bp = _round_up(B, bm)
    x = pad_to(secret, (Bp, d0))
    grid = (Bp // bm,)

    # Weights / biases: constant index_map -> VMEM-resident across grid steps.
    def resident(a):
        return pl.BlockSpec(a.shape, lambda i: (0,) * a.ndim)

    out = pl.pallas_call(
        _mlp_kernel,
        out_shape=jax.ShapeDtypeStruct((Bp, outp), secret.dtype),
        grid=grid,
        in_specs=[
            pl.BlockSpec((bm, d0), lambda i: (i, 0)),
            resident(w1p), resident(b1p),
            resident(w2p), resident(b2p),
            resident(w3p), resident(b3p),
        ],
        out_specs=pl.BlockSpec((bm, outp), lambda i: (i, 0)),
        compiler_params=pltpu.CompilerParams(
            dimension_semantics=("parallel",)),
    )(x, w1p, b1p, w2p, b2p, w3p, b3p)

    return out[:B, :out_dim]


def init_channel_encoder_params(key, secret_size, model_size="small"):
    """Deterministic init matching PyTorch nn.Linear default (U(+-1/sqrt(fan_in)))."""
    assert model_size == "small", "only 'small' variant implemented here"
    dims = [secret_size, secret_size * 3, secret_size * 6, 100]
    params = {}
    keys = jax.random.split(key, 2 * (len(dims) - 1))
    for i, (fan_in, fan_out) in enumerate(zip(dims[:-1], dims[1:])):
        bound = 1.0 / math.sqrt(fan_in)
        wk, bk = keys[2 * i], keys[2 * i + 1]
        # stored [in, out] so the kernel computes x @ w (== x @ W.T in torch)
        params[f"w{i+1}"] = jax.random.uniform(
            wk, (fan_in, fan_out), jnp.float32, -bound, bound)
        params[f"b{i+1}"] = jax.random.uniform(
            bk, (1, fan_out), jnp.float32, -bound, bound)
    return params


def channel_encoder_ref(secret, params):
    """Pure-JAX reference for correctness checks."""
    h = secret
    for i in (1, 2, 3):
        h = jnp.maximum(h @ params[f"w{i}"] + params[f"b{i}"], 0.0)
    return h


if __name__ == "__main__":
    key = jax.random.PRNGKey(0)
    secret_size = 32
    batch = 2

    pkey, xkey, x2key = jax.random.split(key, 3)
    params = init_channel_encoder_params(pkey, secret_size, "small")
    secret = jax.random.uniform(xkey, (batch, secret_size), jnp.float32)
    ref = channel_encoder_ref(secret, params)

    # f32 path: exact vs reference.
    out_f32 = jax.block_until_ready(
        channel_encoder_forward(secret, params, weight_dtype=jnp.float32))
    assert out_f32.shape == (batch, 100), out_f32.shape
    assert jnp.allclose(out_f32, ref, atol=1e-5, rtol=1e-5), "f32 mismatch"

    # bf16-weight path (MXU-friendly on v6e/v7x), f32 accumulation.
    out_bf16 = jax.block_until_ready(
        channel_encoder_forward(secret, params, weight_dtype=jnp.bfloat16))
    assert out_bf16.shape == (batch, 100), out_bf16.shape
    assert jnp.allclose(out_bf16, ref, atol=5e-2, rtol=5e-2), "bf16 mismatch"

    # Larger batch exercises the multi-step, pipelined batch grid (ragged tile).
    big_b = 1025
    secret_big = jax.random.uniform(x2key, (big_b, secret_size), jnp.float32)
    out_big = jax.block_until_ready(
        channel_encoder_forward(secret_big, params, block_m=512,
                                weight_dtype=jnp.bfloat16))
    ref_big = channel_encoder_ref(secret_big, params)
    assert out_big.shape == (big_b, 100), out_big.shape
    assert jnp.allclose(out_big, ref_big, atol=5e-2, rtol=5e-2), "tiled mismatch"

    print("KERNEL_OK")
</pallas_src>

<mosaic_0001>
module attributes {stable_mosaic.version = 11 : i64} {
  func.func @_mlp_kernel(%arg0: i32, %arg1: memref<8x32xf32, #tpu.memory_space<vmem>>, %arg2: memref<32x128xf32, #tpu.memory_space<vmem>>, %arg3: memref<1x128xf32, #tpu.memory_space<vmem>>, %arg4: memref<128x192xf32, #tpu.memory_space<vmem>>, %arg5: memref<1x192xf32, #tpu.memory_space<vmem>>, %arg6: memref<192x128xf32, #tpu.memory_space<vmem>>, %arg7: memref<1x128xf32, #tpu.memory_space<vmem>>, %arg8: memref<8x128xf32, #tpu.memory_space<vmem>>) attributes {dimension_semantics = [#tpu.dimension_semantics<parallel>], iteration_bounds = array<i64: 1>, scalar_prefetch = 0 : i64, scratch_operands = 0 : i64, tpu.core_type = #tpu.core_type<tc>, window_params = [{transform_indices = @transform_0, window_bounds = array<i64: 8, 32>}, {pipeline_mode = #tpu.pipeline_mode<synchronous>, transform_indices = @transform_1, window_bounds = array<i64: 32, 128>}, {pipeline_mode = #tpu.pipeline_mode<synchronous>, transform_indices = @transform_2, window_bounds = array<i64: 1, 128>}, {pipeline_mode = #tpu.pipeline_mode<synchronous>, transform_indices = @transform_3, window_bounds = array<i64: 128, 192>}, {pipeline_mode = #tpu.pipeline_mode<synchronous>, transform_indices = @transform_4, window_bounds = array<i64: 1, 192>}, {pipeline_mode = #tpu.pipeline_mode<synchronous>, transform_indices = @transform_5, window_bounds = array<i64: 192, 128>}, {pipeline_mode = #tpu.pipeline_mode<synchronous>, transform_indices = @transform_6, window_bounds = array<i64: 1, 128>}, {transform_indices = @transform_7, window_bounds = array<i64: 8, 128>}]} {
    %c0 = arith.constant 0 : index
    %c0_0 = arith.constant 0 : index
    %0 = vector.load %arg1[%c0, %c0_0] : memref<8x32xf32, #tpu.memory_space<vmem>>, vector<8x32xf32>
    %c0_1 = arith.constant 0 : index
    %c0_2 = arith.constant 0 : index
    %1 = vector.load %arg2[%c0_1, %c0_2] : memref<32x128xf32, #tpu.memory_space<vmem>>, vector<32x128xf32>
    %cst = arith.constant dense<0.000000e+00> : vector<8x128xf32>
    %2 = tpu.matmul %0, %1, %cst {dimension_numbers = #tpu.dot_dimension_numbers<[1], [0], [0], [1], [0, 0, 1, 1], [], []>} : vector<8x32xf32>, vector<32x128xf32>, vector<8x128xf32> -> vector<8x128xf32>
    %c0_3 = arith.constant 0 : index
    %c0_4 = arith.constant 0 : index
    %3 = vector.load %arg3[%c0_3, %c0_4] : memref<1x128xf32, #tpu.memory_space<vmem>>, vector<1x128xf32>
    %4 = vector.broadcast %3 : vector<1x128xf32> to vector<8x128xf32>
    %5 = arith.addf %2, %4 : vector<8x128xf32>
    %cst_5 = arith.constant 0.000000e+00 : f32
    %6 = vector.broadcast %cst_5 : f32 to vector<8x128xf32>
    %7 = arith.maximumf %5, %6 : vector<8x128xf32>
    %c0_6 = arith.constant 0 : index
    %c0_7 = arith.constant 0 : index
    %8 = vector.load %arg4[%c0_6, %c0_7] : memref<128x192xf32, #tpu.memory_space<vmem>>, vector<128x192xf32>
    %cst_8 = arith.constant dense<0.000000e+00> : vector<8x192xf32>
    %9 = tpu.matmul %7, %8, %cst_8 {dimension_numbers = #tpu.dot_dimension_numbers<[1], [0], [0], [1], [0, 0, 1, 1], [], []>} : vector<8x128xf32>, vector<128x192xf32>, vector<8x192xf32> -> vector<8x192xf32>
    %c0_9 = arith.constant 0 : index
    %c0_10 = arith.constant 0 : index
    %10 = vector.load %arg5[%c0_9, %c0_10] : memref<1x192xf32, #tpu.memory_space<vmem>>, vector<1x192xf32>
    %11 = vector.broadcast %10 : vector<1x192xf32> to vector<8x192xf32>
    %12 = arith.addf %9, %11 : vector<8x192xf32>
    %cst_11 = arith.constant 0.000000e+00 : f32
    %13 = vector.broadcast %cst_11 : f32 to vector<8x192xf32>
    %14 = arith.maximumf %12, %13 : vector<8x192xf32>
    %c0_12 = arith.constant 0 : index
    %c0_13 = arith.constant 0 : index
    %15 = vector.load %arg6[%c0_12, %c0_13] : memref<192x128xf32, #tpu.memory_space<vmem>>, vector<192x128xf32>
    %cst_14 = arith.constant dense<0.000000e+00> : vector<8x128xf32>
    %16 = tpu.matmul %14, %15, %cst_14 {dimension_numbers = #tpu.dot_dimension_numbers<[1], [0], [0], [1], [0, 0, 1, 1], [], []>} : vector<8x192xf32>, vector<192x128xf32>, vector<8x128xf32> -> vector<8x128xf32>
    %c0_15 = arith.constant 0 : index
    %c0_16 = arith.constant 0 : index
    %17 = vector.load %arg7[%c0_15, %c0_16] : memref<1x128xf32, #tpu.memory_space<vmem>>, vector<1x128xf32>
    %18 = vector.broadcast %17 : vector<1x128xf32> to vector<8x128xf32>
    %19 = arith.addf %16, %18 : vector<8x128xf32>
    %cst_17 = arith.constant 0.000000e+00 : f32
    %20 = vector.broadcast %cst_17 : f32 to vector<8x128xf32>
    %21 = arith.maximumf %19, %20 : vector<8x128xf32>
    %c0_18 = arith.constant 0 : index
    %c0_19 = arith.constant 0 : index
    %22 = vector.load %arg8[%c0_18, %c0_19] : memref<8x128xf32, #tpu.memory_space<vmem>>, vector<8x128xf32>
    tpu.vector_store %arg8[%c0_18, %c0_19], %21 {strides = array<i32>} : memref<8x128xf32, #tpu.memory_space<vmem>>, vector<8x128xf32>,
    return
  }
  func.func @transform_0(%arg0: i32) -> (i32, i32) {
    %c0_i32 = arith.constant 0 : i32
    %c0_i32_0 = arith.constant 0 : i32
    return %arg0, %c0_i32 : i32, i32
  }
  func.func @transform_1(%arg0: i32) -> (i32, i32) {
    %c0_i32 = arith.constant 0 : i32
    %c0_i32_0 = arith.constant 0 : i32
    %c0_i32_1 = arith.constant 0 : i32
    return %c0_i32, %c0_i32_0 : i32, i32
  }
  func.func @transform_2(%arg0: i32) -> (i32, i32) {
    %c0_i32 = arith.constant 0 : i32
    %c0_i32_0 = arith.constant 0 : i32
    %c0_i32_1 = arith.constant 0 : i32
    return %c0_i32, %c0_i32_0 : i32, i32
  }
  func.func @transform_3(%arg0: i32) -> (i32, i32) {
    %c0_i32 = arith.constant 0 : i32
    %c0_i32_0 = arith.constant 0 : i32
    %c0_i32_1 = arith.constant 0 : i32
    return %c0_i32, %c0_i32_0 : i32, i32
  }
  func.func @transform_4(%arg0: i32) -> (i32, i32) {
    %c0_i32 = arith.constant 0 : i32
    %c0_i32_0 = arith.constant 0 : i32
    %c0_i32_1 = arith.constant 0 : i32
    return %c0_i32, %c0_i32_0 : i32, i32
  }
  func.func @transform_5(%arg0: i32) -> (i32, i32) {
    %c0_i32 = arith.constant 0 : i32
    %c0_i32_0 = arith.constant 0 : i32
    %c0_i32_1 = arith.constant 0 : i32
    return %c0_i32, %c0_i32_0 : i32, i32
  }
  func.func @transform_6(%arg0: i32) -> (i32, i32) {
    %c0_i32 = arith.constant 0 : i32
    %c0_i32_0 = arith.constant 0 : i32
    %c0_i32_1 = arith.constant 0 : i32
    return %c0_i32, %c0_i32_0 : i32, i32
  }
  func.func @transform_7(%arg0: i32) -> (i32, i32) {
    %c0_i32 = arith.constant 0 : i32
    %c0_i32_0 = arith.constant 0 : i32
    return %arg0, %c0_i32 : i32, i32
  }
}

</mosaic_0001>

<bundles_post_ra>
// kernel: tpu_custom_call.1
= control target key start
LH: loop header
LB: loop body
LE: loop exit
PB: predicated region body
PF: predicated region fallthrough
CT: control target
= control target key end

     0   :  { %vm36_vm0 = vcmask 261120   ;;  %s498_s0 = inlined_call_operand.vmem [shape: f32[8,32], index: 0, kind: input, shape index: {}]   ;;  %s499_s1 = inlined_call_operand.vmem [shape: f32[32,128], index: 1, kind: input, shape index: {}]   ;;  %s500_s2 = inlined_call_operand.vmem [shape: f32[1,128], index: 2, kind: input, shape index: {}]   ;;  %s501_s3 = inlined_call_operand.vmem [shape: f32[128,192], index: 3, kind: input, shape index: {}]   ;;  %s502_s4 = inlined_call_operand.vmem [shape: f32[1,192], index: 4, kind: input, shape index: {}]   ;;  %s503_s5 = inlined_call_operand.vmem [shape: f32[192,128], index: 5, kind: input, shape index: {}]   ;;  %s504_s6 = inlined_call_operand.vmem [shape: f32[1,128], index: 6, kind: input, shape index: {}]   ;;  %s505_s7 = inlined_call_operand.hbm [shape: f32[8,128], index: 7, kind: output, shape index: {}]  }
   0x1   :  { %v31_v0 = vld [vmem:[%s499_s1 + $0x18] sm:$0xff]  ;;  %v30_v1 = vld [vmem:[%s499_s1 + $0x10] sm:$0xff]  ;;  %v29_v2 = vld [vmem:[%s499_s1 + $0x8] sm:$0xff] }
   0x2   :  { %52 = vmatpush.msra.mxu0 %v31_v0  ;;  %v91_v3 = vld [vmem:[%s501_s3 + $0xf0] sm:$0xff]  ;;  %v92_v4 = vld [vmem:[%s501_s3 + $0xf8] sm:$0xff]  ;;  %v89_v5 = vld [vmem:[%s501_s3 + $0xe0] sm:$0xff] }
   0x3   :  { %99 = vmatpush.msra.mxu1 %v91_v3  ;;  %v90_v6 = vld [vmem:[%s501_s3 + $0xe8] sm:$0xff]  ;;  %119 = vmatpush.msra.mxu2 %v92_v4  ;;  %v87_v7 = vld [vmem:[%s501_s3 + $0xd0] sm:$0xff]  ;;  %v28_v8 = vld [vmem:[%s499_s1] sm:$0xff] }
   0x4   :  { %53 = vmatpush.msra.mxu0 %v30_v1  ;;  %v88_v9 = vld [vmem:[%s501_s3 + $0xd8] sm:$0xff]  ;;  %v27_v10 = vld [vmem:[%s498_s0] sm:$0xff]  ;;  %v86_v12 = vld [vmem:[%s501_s3 + $0xc8] sm:$0xff] }
   0x5   :  { %100 = vmatpush.msra.mxu1 %v89_v5  ;;  %120 = vmatpush.msra.mxu2 %v90_v6  ;;  %v85_v11 = vld [vmem:[%s501_s3 + $0xc0] sm:$0xff]  ;;  %v83_v13 = vld [vmem:[%s501_s3 + $0xb0] sm:$0xff]  ;;  %v84_v14 = vld [vmem:[%s501_s3 + $0xb8] sm:$0xff] }
   0x6   :  { %54 = vmatpush.msra.mxu0 %v29_v2  ;;  %v81_v15 = vld [vmem:[%s501_s3 + $0xa0] sm:$0xff]  ;;  %v82_v16 = vld [vmem:[%s501_s3 + $0xa8] sm:$0xff]  ;;  %v79_v17 = vld [vmem:[%s501_s3 + $0x90] sm:$0xff] }
   0x7   :  { %101 = vmatpush.msra.mxu1 %v87_v7  ;;  %121 = vmatpush.msra.mxu2 %v88_v9 }
   0x8   :  { %55 = vmatpush.msra.mxu0 %v28_v8 }
   0x9   :  { %231 = vmatmul.msk.f32.vlgmr.msra.gmra.mxu0 %vm36_vm0, %v27_v10  ;;  %102 = vmatpush.msra.mxu1 %v85_v11 }
   0xa   :  { %122 = vmatpush.msra.mxu2 %v86_v12 }
   0xb   :  { %103 = vmatpush.msra.mxu1 %v83_v13 }
   0xc   :  { %123 = vmatpush.msra.mxu2 %v84_v14 }
   0xd   :  { %12 = vsyncpa [#allocation3], 0  ;;  %104 = vmatpush.msra.mxu1 %v81_v15  ;;  %v80_v18 = vld [vmem:[%s501_s3 + $0x98] sm:$0xff]  ;;  %v77_v19 = vld [vmem:[%s501_s3 + $0x80] sm:$0xff]  ;;  %vm169_vm1 = vcmask 523264   ;;  %s222_s27 = sshll.u32 %s505_s7, 4  ;;  %s223_s27 = int_to_ptr.hbm [resolvable:$true] %s222_s27 }
   0xe   :  { %124 = vmatpush.msra.mxu2 %v82_v16  ;;  %v78_v20 = vld [vmem:[%s501_s3 + $0x88] sm:$0xff]  ;;  %v75_v21 = vld [vmem:[%s501_s3 + $0x70] sm:$0xff]  ;;  %v76_v22 = vld [vmem:[%s501_s3 + $0x78] sm:$0xff] }
   0xf   :  { %105 = vmatpush.msra.mxu1 %v79_v17  ;;  %v73_v23 = vld [vmem:[%s501_s3 + $0x60] sm:$0xff]  ;;  %v74_v24 = vld [vmem:[%s501_s3 + $0x68] sm:$0xff]  ;;  %v71_v25 = vld [vmem:[%s501_s3 + $0x50] sm:$0xff] }
  0x10   :  { %125 = vmatpush.msra.mxu2 %v80_v18  ;;  %v72_v26 = vld [vmem:[%s501_s3 + $0x58] sm:$0xff]  ;;  %v69_v27 = vld [vmem:[%s501_s3 + $0x40] sm:$0xff]  ;;  %v70_v28 = vld [vmem:[%s501_s3 + $0x48] sm:$0xff] }
  0x11   :  { %106 = vmatpush.msra.mxu1 %v77_v19  ;;  %v67_v29 = vld [vmem:[%s501_s3 + $0x30] sm:$0xff]  ;;  %v68_v30 = vld [vmem:[%s501_s3 + $0x38] sm:$0xff]  ;;  %v65_v31 = vld [vmem:[%s501_s3 + $0x20] sm:$0xff] }
  0x12   :  { %126 = vmatpush.msra.mxu2 %v78_v20  ;;  %v66_v32 = vld [vmem:[%s501_s3 + $0x28] sm:$0xff]  ;;  %v63_v33 = vld [vmem:[%s501_s3 + $0x10] sm:$0xff]  ;;  %v64_v34 = vld [vmem:[%s501_s3 + $0x18] sm:$0xff] }
  0x13   :  { %107 = vmatpush.msra.mxu1 %v75_v21  ;;  %v61_v35 = vld [vmem:[%s501_s3] sm:$0xff]  ;;  %v62_v36 = vld [vmem:[%s501_s3 + $0x8] sm:$0xff]  ;;  %v156_v37 = vld [vmem:[%s503_s5 + $0x78] sm:$0xff] }
  0x14   :  { %127 = vmatpush.msra.mxu2 %v76_v22  ;;  %v155_v38 = vld [vmem:[%s503_s5 + $0x70] sm:$0xff]  ;;  %173 = vmatpush.msra.mxu3 %v156_v37  ;;  %v154_v39 = vld [vmem:[%s503_s5 + $0x68] sm:$0xff]  ;;  %v153_v40 = vld [vmem:[%s503_s5 + $0x60] sm:$0xff] }
  0x15   :  { %108 = vmatpush.msra.mxu1 %v73_v23  ;;  %v164_v41 = vld [vmem:[%s503_s5 + $0xb8] sm:$0xff]  ;;  %v163_v42 = vld [vmem:[%s503_s5 + $0xb0] sm:$0xff]  ;;  %v150_v45 = vld [vmem:[%s503_s5 + $0x48] sm:$0xff] }
  0x16   :  { %128 = vmatpush.msra.mxu2 %v74_v24  ;;  %174 = vmatpush.msra.mxu3 %v155_v38  ;;  %v152_v43 = vld [vmem:[%s503_s5 + $0x58] sm:$0xff]  ;;  %v151_v44 = vld [vmem:[%s503_s5 + $0x50] sm:$0xff]  ;;  %v149_v46 = vld [vmem:[%s503_s5 + $0x40] sm:$0xff] }
  0x17   :  { %109 = vmatpush.msra.mxu1 %v71_v25  ;;  %201 = vmatpush.msrb.mxu0 %v164_v41  ;;  %v148_v47 = vld [vmem:[%s503_s5 + $0x38] sm:$0xff]  ;;  %v147_v48 = vld [vmem:[%s503_s5 + $0x30] sm:$0xff]  ;;  %v146_v49 = vld [vmem:[%s503_s5 + $0x28] sm:$0xff] }
  0x18   :  { %129 = vmatpush.msra.mxu2 %v72_v26  ;;  %175 = vmatpush.msra.mxu3 %v154_v39  ;;  %v145_v50 = vld [vmem:[%s503_s5 + $0x20] sm:$0xff]  ;;  %v144_v51 = vld [vmem:[%s503_s5 + $0x18] sm:$0xff]  ;;  %v143_v56 = vld [vmem:[%s503_s5 + $0x10] sm:$0xff] }
  0x19   :  { %110 = vmatpush.msra.mxu1 %v69_v27  ;;  %202 = vmatpush.msrb.mxu0 %v163_v42  ;;  %v234_v52 = vld [vmem:[%s500_s2] ss:$0 sm:$0xff]  ;;  %v162_v57 = vld [vmem:[%s503_s5 + $0xa8] sm:$0xff]  ;;  %v160_v61 = vld [vmem:[%s503_s5 + $0x98] sm:$0xff] }
  0x1a   :  { %130 = vmatpush.msra.mxu2 %v70_v28  ;;  %176 = vmatpush.msra.mxu3 %v153_v40  ;;  %v142_v58 = vld [vmem:[%s503_s5 + $0x8] sm:$0xff]  ;;  %v161_v59 = vld [vmem:[%s503_s5 + $0xa0] sm:$0xff]  ;;  %v159_v62 = vld [vmem:[%s503_s5 + $0x90] sm:$0xff] }
  0x1b   :  { %111 = vmatpush.msra.mxu1 %v67_v29  ;;  %203 = vmatpush.msrb.mxu0 %v162_v57  ;;  %v141_v60 = vld [vmem:[%s503_s5] sm:$0xff]  ;;  %v158_v63 = vld [vmem:[%s503_s5 + $0x88] sm:$0xff] }
  0x1c   :  { %131 = vmatpush.msra.mxu2 %v68_v30  ;;  %177 = vmatpush.msra.mxu3 %v152_v43  ;;  %v157_v0 = vld [vmem:[%s503_s5 + $0x80] sm:$0xff]  ;;  %s262_s5 = smov [#allocation2]  }
  0x1d   :  { %112 = vmatpush.msra.mxu1 %v65_v31  ;;  %204 = vmatpush.msrb.mxu0 %v161_v59  ;;  %v93_v1 = vld [vmem:[%s502_s4] sm:$0x3]  ;;  %s220_s4 = sshll.u32 %s262_s5, 4  ;;  %s221_s4 = int_to_ptr.vmem [resolvable:$true] %s220_s4 }
  0x1e   :  { %132 = vmatpush.msra.mxu2 %v66_v32  ;;  %178 = vmatpush.msra.mxu3 %v151_v44  ;;  %v95_v2 = vperm.slane %v93_v1, 0  ;;  %v96_v6 = vperm.slane %v93_v1, 1  ;;  %v235_v10 = vld [vmem:[%s504_s6] ss:$0 sm:$0xff] }
  0x1f   :  { %113 = vmatpush.msra.mxu1 %v63_v33  ;;  %205 = vmatpush.msrb.mxu0 %v160_v61 }
  0x20   :  { %133 = vmatpush.msra.mxu2 %v64_v34  ;;  %179 = vmatpush.msra.mxu3 %v150_v45 }
  0x21   :  { %114 = vmatpush.msra.mxu1 %v61_v35  ;;  %206 = vmatpush.msrb.mxu0 %v159_v62 }
  0x22   :  { %134 = vmatpush.msra.mxu2 %v62_v36  ;;  %180 = vmatpush.msra.mxu3 %v149_v46 }
  0x23   :  { %207 = vmatpush.msrb.mxu0 %v158_v63 }
  0x24   :  { %181 = vmatpush.msra.mxu3 %v148_v47 }
  0x25   :  { %208 = vmatpush.msrb.mxu0 %v157_v0 }
  0x26   :  { %182 = vmatpush.msra.mxu3 %v147_v48 }
  0x28   :  { %183 = vmatpush.msra.mxu3 %v146_v49 }
  0x2a   :  { %184 = vmatpush.msra.mxu3 %v145_v50 }
  0x2c   :  { %185 = vmatpush.msra.mxu3 %v144_v51 }
  0x2e   :  { %186 = vmatpush.msra.mxu3 %v143_v56 }
  0x30   :  { %187 = vmatpush.msra.mxu3 %v142_v58 }
  0x32   :  { %188 = vmatpush.msra.mxu3 %v141_v60 }
  0x86   :  { %v57_v53 = vpop.f32.mrf.mxu0 }
  0x87   :  { %v58_v54 = vadd.f32 %v234_v52, %v57_v53 }
  0x89   :  { %v60_v55 = vmax.f32 %v58_v54, 0.0 }
  0x8b   :  { %115 = vmatmul.f32.vlgmr.msra.gmra.mxu1 %v60_v55  ;;  %135 = vmatmul.f32.vlgmr.msra.gmra.mxu2 %v60_v55 }
 0x108   :  { %v116_v3 = vpop.f32.mrf.mxu1 }
 0x109   :  { %v117_v4 = vadd.f32 %v116_v3, %v95_v2 }
 0x10b   :  { %v139_v5 = vmax.f32 %v117_v4, 0.0 }
 0x10d   :  { %189 = vmatmul.f32.vlgmr.msra.gmra.mxu3 %v139_v5 }
 0x10e   :  { %v136_v7 = vpop.f32.mrf.mxu2 }
 0x10f   :  { %v137_v8 = vadd.f32 %v136_v7, %v96_v6 }
 0x111   :  { %v140_v9 = vmax.f32 %v137_v8, 0.0 }
 0x113   :  { %232 = vmatmul.msk.f32.vlgmr.msrb.gmra.mxu0 %vm169_vm1, %v140_v9 }
 0x190   :  { %v190_v11 = vpop.f32.mrf.mxu3  ;;  %v210_v13 = vpop.f32.mrf.mxu0 }
 0x191   :  { %v191_v12 = vadd.f32 %v235_v10, %v190_v11 }
 0x193   :  { %v211_v14 = vadd.f32 %v210_v13, %v191_v12 }
 0x195   :  { %v213_v15 = vmax.f32 %v211_v14, 0.0 }
 0x197   :  { %214 = vst [vmem:[#allocation2] sm:$0xff] %v213_v15 }
 0x198   :  { %225 = dma.vmem_to_hbm [thread:$0]  %s221_s4, 128, %s223_s27, [#allocation3]  }
 0x199   :  { %260 = dma.done.wait [#allocation3], 128  }
 0x19a   :  { %261 = vsyncadd [#allocation3], 4294967168 }
 0x19b   :  { %230 = vsyncpa [#allocation3], 1 }

</bundles_post_ra>
